<compile_context>
chip_gen: v7x
topology: tpu7x:2x2x1
jax: 0.10.0
libtpu: 0.0.40
codegen_flags: <defaults>
</compile_context>

<pallas_src>
import jax
import jax.numpy as jnp
from jax.experimental import pallas as pl
from jax.experimental.pallas import tpu as pltpu


def _round_up(x: int, m: int) -> int:
    return ((x + m - 1) // m) * m


def _make_kernel(num_layers: int, h0: int, later_out_dims):
    """Kernel for one batch tile (batch on lanes).

    Args (refs): comp (in_dim, T), w0_aug (h0+1, in_dim),
                 w_1..w_{L-1} (d_out, d_in), [bias_all (max_d, L-1)], out (out_dim, T)
    """
    n_later = num_layers - 1

    def kernel(comp_ref, w0_ref, *refs):
        later_w_refs = refs[:n_later]
        bias_ref = refs[n_later] if n_later > 0 else None
        out_ref = refs[-1]

        comp = comp_ref[...]                                                 # (in_dim, T)

        # Layer 0: embedding/bias folded into w0; the appended ones-row emits denom.
        z = jnp.dot(w0_ref[...], comp, preferred_element_type=jnp.float32)  # (h0+1, T)
        denom = z[h0:h0 + 1, :]                                              # (1, T)
        h = z[:h0, :] * pl.reciprocal(denom, approx=False)                   # (h0, T)

        if n_later > 0:
            b_all = bias_ref[...]                                            # (max_d, L-1)
            for l in range(n_later):
                h = h * jax.nn.sigmoid(h)                                    # SiLU (EUP)
                d_out = later_out_dims[l]
                w = later_w_refs[l][...]                                     # (d_out, d_in)
                b = b_all[0:d_out, l:l + 1]                                  # (d_out, 1)
                h = jnp.dot(w, h, preferred_element_type=jnp.float32) + b

        out_ref[...] = h.astype(out_ref.dtype)          # single lane-dense full store

    return kernel


def composition_embedding(composition, embedding, weights, biases, *, tile_n=None):
    """Forward pass of CompositionEmbedding.

    composition: (N, in_dim) f32
    embedding:   (in_dim, h_dim[0]) f32
    weights:     PyTorch-layout Linear weights:
                 [(h_dim[0], in_dim*h_dim[0]), (h_dim[1], h_dim[0]), ..., (out_dim, h_dim[-1])]
    biases:      [(h_dim[0],), ..., (out_dim,)]
    """
    n, in_dim = composition.shape
    in_dim_e, h0_e = embedding.shape
    assert in_dim == in_dim_e
    num_layers = len(weights)
    h0d = int(weights[0].shape[0])               # == h_dim[0]
    out_dim = int(weights[-1].shape[0])
    assert weights[0].shape[1] == in_dim * h0_e

    # ---- one-time wrapper-side folding / layout plumbing --------------------
    # w0_eff_T[j, a] = sum_b E[a, b] * W0[j, a*h0 + b]
    w0 = jnp.asarray(weights[0], jnp.float32)
    w0_eff_t = jnp.einsum(
        "ab,jab->ja", jnp.asarray(embedding, jnp.float32),
        w0.reshape(h0d, in_dim, h0_e),
        precision=jax.lax.Precision.HIGHEST)                      # (h0d, in_dim)
    w0_main = w0_eff_t + jnp.asarray(biases[0], jnp.float32)[:, None]
    w0_aug = jnp.concatenate(
        [w0_main, jnp.ones((1, in_dim), jnp.float32)], axis=0)    # (h0d+1, in_dim)

    later_weights = [jnp.asarray(w, jnp.float32) for w in weights[1:]]  # (d_out, d_in)
    later_dims = [int(w.shape[0]) for w in later_weights]
    if num_layers > 1:
        max_d = max(later_dims)
        bias_all = jnp.zeros((max_d, num_layers - 1), jnp.float32)
        for l, b in enumerate(biases[1:]):
            bias_all = bias_all.at[: b.shape[0], l].set(jnp.asarray(b, jnp.float32))
    else:
        bias_all = None

    # ---- batch tiling: big, 256-aligned lane tiles ---------------------------
    n256 = _round_up(n, 256)
    if tile_n is None:
        if n256 <= 256:
            tile_n = 256                              # tiny batch: one grid step
        elif n256 <= 8192:
            tile_n = _round_up(n256 // 2, 256)        # >=2 steps -> both v7x TCs
        else:
            tile_n = 4096
    tile_n = int(min(max(_round_up(int(tile_n), 256), 256), 8192))
    n_pad = _round_up(n, tile_n)
    grid = (n_pad // tile_n,)

    comp_t = jnp.asarray(composition, jnp.float32).T              # (in_dim, n)
    if n_pad != n:
        # Pad columns with ones so padded rows normalize cleanly (discarded later).
        comp_t = jnp.concatenate(
            [comp_t, jnp.ones((in_dim, n_pad - n), comp_t.dtype)], axis=1)

    def resident(shape):
        return pl.BlockSpec(shape, lambda i: (0, 0))               # fully resident

    in_specs = [pl.BlockSpec((in_dim, tile_n), lambda i: (0, i)),  # comp tile
                resident(w0_aug.shape)]
    args = [comp_t, w0_aug]
    for w in later_weights:
        in_specs.append(resident(w.shape))
        args.append(w)
    if bias_all is not None:
        in_specs.append(resident(bias_all.shape))
        args.append(bias_all)
    out_specs = pl.BlockSpec((out_dim, tile_n), lambda i: (0, i))

    # ---- cost estimate -------------------------------------------------------
    layer_dims = [(in_dim, h0d + 1)] + [(int(w.shape[1]), int(w.shape[0]))
                                        for w in later_weights]
    flops = int(sum(2 * n_pad * di * do for di, do in layer_dims))
    if num_layers > 1:
        transcendentals = int(n_pad * (h0d + sum(later_dims[:-1])))
    else:
        transcendentals = 0
    bytes_accessed = int(4 * (comp_t.size + n_pad * out_dim + w0_aug.size
                              + sum(w.size for w in later_weights)
                              + (bias_all.size if bias_all is not None else 0)))

    out_t = pl.pallas_call(
        _make_kernel(num_layers, h0d, later_dims),
        out_shape=jax.ShapeDtypeStruct((out_dim, n_pad), jnp.float32),
        grid_spec=pltpu.PrefetchScalarGridSpec(
            num_scalar_prefetch=0,
            grid=grid,
            in_specs=in_specs,
            out_specs=out_specs,
        ),
        compiler_params=pltpu.CompilerParams(
            dimension_semantics=("parallel",),     # batch tiles shard across TCs (v7x)
        ),
        cost_estimate=pl.CostEstimate(
            flops=flops,
            transcendentals=transcendentals,
            bytes_accessed=bytes_accessed,
        ),
    )(*args)

    return out_t[:, :n].T                           # back to (N, out_dim)


def composition_embedding_ref(composition, embedding, weights, biases):
    """Pure-JAX faithful port of the PyTorch forward (no folding)."""
    nc = composition / jnp.sum(composition, axis=-1, keepdims=True)
    x = (nc[..., None] * embedding[None, ...]).reshape(composition.shape[0], -1)
    for i, (w, b) in enumerate(zip(weights, biases)):
        x = jnp.dot(x, w.T, precision=jax.lax.Precision.HIGHEST) + b
        if i < len(weights) - 1:
            x = x * jax.nn.sigmoid(x)
    return x


if __name__ == "__main__":
    # Module config: in_dim=8, out_dim=16, h_dim=[32, 32]; batch N=500
    # (pads to 512, 2 grid steps of 256 -> exercises tiling, padding, dual-TC path).
    in_dim, out_dim = 8, 16
    h_dim = [32, 32]
    n = 500

    key = jax.random.PRNGKey(0)
    keys = jax.random.split(key, 2 + 2 * (len(h_dim) + 1))

    # embedding parameter ~ torch.randn(in_dim, h_dim[0])
    embedding = jax.random.normal(keys[0], (in_dim, h_dim[0]), dtype=jnp.float32)

    # MLP: Linear(in_dim*h0 -> h0), SiLU, Linear(h0 -> h1), SiLU, Linear(h1 -> out_dim)
    dims = [h_dim[0] * in_dim] + h_dim + [out_dim]
    weights, biases = [], []
    for li in range(len(dims) - 1):
        scale = 1.0 / jnp.sqrt(jnp.float32(dims[li]))
        weights.append(scale * jax.random.normal(
            keys[2 + 2 * li], (dims[li + 1], dims[li]), dtype=jnp.float32))
        biases.append(scale * jax.random.normal(
            keys[3 + 2 * li], (dims[li + 1],), dtype=jnp.float32))

    # Positive compositions so the row-sum normalization is well defined
    # (same assumption as the PyTorch module; zero-sum rows would be Inf/NaN there too).
    composition = jax.random.uniform(
        keys[1], (n, in_dim), dtype=jnp.float32, minval=0.1, maxval=1.0)

    out = composition_embedding(composition, embedding, weights, biases)
    out = jax.block_until_ready(out)

    ref = composition_embedding_ref(composition, embedding, weights, biases)
    assert out.shape == (n, out_dim), out.shape
    assert jnp.allclose(out, ref, atol=1e-4, rtol=1e-4), (
        "mismatch vs reference: max abs err = %e" % float(jnp.max(jnp.abs(out - ref))))

    print("KERNEL_OK")
</pallas_src>

<mosaic_0001>
module attributes {stable_mosaic.version = 11 : i64} {
  func.func @kernel(%arg0: i32, %arg1: memref<8x256xf32, #tpu.memory_space<vmem>>, %arg2: memref<33x8xf32, #tpu.memory_space<vmem>>, %arg3: memref<32x32xf32, #tpu.memory_space<vmem>>, %arg4: memref<16x32xf32, #tpu.memory_space<vmem>>, %arg5: memref<32x2xf32, #tpu.memory_space<vmem>>, %arg6: memref<16x256xf32, #tpu.memory_space<vmem>>) attributes {dimension_semantics = [#tpu.dimension_semantics<parallel>], iteration_bounds = array<i64: 2>, scalar_prefetch = 0 : i64, scratch_operands = 0 : i64, tpu.core_type = #tpu.core_type<tc>, window_params = [{transform_indices = @transform_0, window_bounds = array<i64: 8, 256>}, {pipeline_mode = #tpu.pipeline_mode<synchronous>, transform_indices = @transform_1, window_bounds = array<i64: 33, 8>}, {pipeline_mode = #tpu.pipeline_mode<synchronous>, transform_indices = @transform_2, window_bounds = array<i64: 32, 32>}, {pipeline_mode = #tpu.pipeline_mode<synchronous>, transform_indices = @transform_3, window_bounds = array<i64: 16, 32>}, {pipeline_mode = #tpu.pipeline_mode<synchronous>, transform_indices = @transform_4, window_bounds = array<i64: 32, 2>}, {transform_indices = @transform_5, window_bounds = array<i64: 16, 256>}]} {
    %c0 = arith.constant 0 : index
    %c0_0 = arith.constant 0 : index
    %0 = vector.load %arg1[%c0, %c0_0] : memref<8x256xf32, #tpu.memory_space<vmem>>, vector<8x256xf32>
    %c0_1 = arith.constant 0 : index
    %c0_2 = arith.constant 0 : index
    %1 = vector.load %arg2[%c0_1, %c0_2] : memref<33x8xf32, #tpu.memory_space<vmem>>, vector<33x8xf32>
    %cst = arith.constant dense<0.000000e+00> : vector<33x256xf32>
    %2 = tpu.matmul %1, %0, %cst {dimension_numbers = #tpu.dot_dimension_numbers<[1], [0], [0], [1], [0, 0, 1, 1], [], []>} : vector<33x8xf32>, vector<8x256xf32>, vector<33x256xf32> -> vector<33x256xf32>
    %3 = vector.extract_strided_slice %2 {offsets = [32, 0], sizes = [1, 256], strides = [1, 1]} : vector<33x256xf32> to vector<1x256xf32>
    %4 = vector.extract_strided_slice %2 {offsets = [0, 0], sizes = [32, 256], strides = [1, 1]} : vector<33x256xf32> to vector<32x256xf32>
    %5 = tpu.reciprocal %3 : vector<1x256xf32> -> vector<1x256xf32>
    %6 = vector.broadcast %5 : vector<1x256xf32> to vector<32x256xf32>
    %7 = arith.mulf %4, %6 : vector<32x256xf32>
    %c0_3 = arith.constant 0 : index
    %c0_4 = arith.constant 0 : index
    %8 = vector.load %arg5[%c0_3, %c0_4] : memref<32x2xf32, #tpu.memory_space<vmem>>, vector<32x2xf32>
    %9 = arith.negf %7 : vector<32x256xf32>
    %10 = math.exp %9 : vector<32x256xf32>
    %cst_5 = arith.constant 1.000000e+00 : f32
    %11 = vector.broadcast %cst_5 : f32 to vector<32x256xf32>
    %12 = arith.addf %11, %10 : vector<32x256xf32>
    %13 = arith.divf %11, %12 : vector<32x256xf32>
    %14 = arith.mulf %7, %13 : vector<32x256xf32>
    %c0_6 = arith.constant 0 : index
    %c0_7 = arith.constant 0 : index
    %15 = vector.load %arg3[%c0_6, %c0_7] : memref<32x32xf32, #tpu.memory_space<vmem>>, vector<32x32xf32>
    %16 = vector.extract_strided_slice %8 {offsets = [0, 0], sizes = [32, 1], strides = [1, 1]} : vector<32x2xf32> to vector<32x1xf32>
    %cst_8 = arith.constant dense<0.000000e+00> : vector<32x256xf32>
    %17 = tpu.matmul %15, %14, %cst_8 {dimension_numbers = #tpu.dot_dimension_numbers<[1], [0], [0], [1], [0, 0, 1, 1], [], []>} : vector<32x32xf32>, vector<32x256xf32>, vector<32x256xf32> -> vector<32x256xf32>
    %18 = vector.broadcast %16 : vector<32x1xf32> to vector<32x256xf32>
    %19 = arith.addf %17, %18 : vector<32x256xf32>
    %20 = arith.negf %19 : vector<32x256xf32>
    %21 = math.exp %20 : vector<32x256xf32>
    %cst_9 = arith.constant 1.000000e+00 : f32
    %22 = vector.broadcast %cst_9 : f32 to vector<32x256xf32>
    %23 = arith.addf %22, %21 : vector<32x256xf32>
    %24 = arith.divf %22, %23 : vector<32x256xf32>
    %25 = arith.mulf %19, %24 : vector<32x256xf32>
    %c0_10 = arith.constant 0 : index
    %c0_11 = arith.constant 0 : index
    %26 = vector.load %arg4[%c0_10, %c0_11] : memref<16x32xf32, #tpu.memory_space<vmem>>, vector<16x32xf32>
    %27 = vector.extract_strided_slice %8 {offsets = [0, 1], sizes = [16, 1], strides = [1, 1]} : vector<32x2xf32> to vector<16x1xf32>
    %cst_12 = arith.constant dense<0.000000e+00> : vector<16x256xf32>
    %28 = tpu.matmul %26, %25, %cst_12 {dimension_numbers = #tpu.dot_dimension_numbers<[1], [0], [0], [1], [0, 0, 1, 1], [], []>} : vector<16x32xf32>, vector<32x256xf32>, vector<16x256xf32> -> vector<16x256xf32>
    %29 = vector.broadcast %27 : vector<16x1xf32> to vector<16x256xf32>
    %30 = arith.addf %28, %29 : vector<16x256xf32>
    %c0_13 = arith.constant 0 : index
    %c0_14 = arith.constant 0 : index
    %31 = vector.load %arg6[%c0_13, %c0_14] : memref<16x256xf32, #tpu.memory_space<vmem>>, vector<16x256xf32>
    tpu.vector_store %arg6[%c0_13, %c0_14], %30 {strides = array<i32>} : memref<16x256xf32, #tpu.memory_space<vmem>>, vector<16x256xf32>,
    return
  }
  func.func @transform_0(%arg0: i32) -> (i32, i32) {
    %c0_i32 = arith.constant 0 : i32
    %c0_i32_0 = arith.constant 0 : i32
    return %c0_i32, %arg0 : i32, i32
  }
  func.func @transform_1(%arg0: i32) -> (i32, i32) {
    %c0_i32 = arith.constant 0 : i32
    %c0_i32_0 = arith.constant 0 : i32
    %c0_i32_1 = arith.constant 0 : i32
    return %c0_i32, %c0_i32_0 : i32, i32
  }
  func.func @transform_2(%arg0: i32) -> (i32, i32) {
    %c0_i32 = arith.constant 0 : i32
    %c0_i32_0 = arith.constant 0 : i32
    %c0_i32_1 = arith.constant 0 : i32
    return %c0_i32, %c0_i32_0 : i32, i32
  }
  func.func @transform_3(%arg0: i32) -> (i32, i32) {
    %c0_i32 = arith.constant 0 : i32
    %c0_i32_0 = arith.constant 0 : i32
    %c0_i32_1 = arith.constant 0 : i32
    return %c0_i32, %c0_i32_0 : i32, i32
  }
  func.func @transform_4(%arg0: i32) -> (i32, i32) {
    %c0_i32 = arith.constant 0 : i32
    %c0_i32_0 = arith.constant 0 : i32
    %c0_i32_1 = arith.constant 0 : i32
    return %c0_i32, %c0_i32_0 : i32, i32
  }
  func.func @transform_5(%arg0: i32) -> (i32, i32) {
    %c0_i32 = arith.constant 0 : i32
    %c0_i32_0 = arith.constant 0 : i32
    return %c0_i32, %arg0 : i32, i32
  }
}

</mosaic_0001>

<bundles_post_ra>
// kernel: tpu_custom_call.1
= control target key start
LH: loop header
LB: loop body
LE: loop exit
PB: predicated region body
PF: predicated region fallthrough
CT: control target
= control target key end

     0   :  { %10 = vsyncpa [#allocation3], 0  ;;  %s1235_s0 = inlined_call_operand.vmem [shape: f32[8,512], index: 0, kind: input, shape index: {}]   ;;  %s1236_s1 = inlined_call_operand.vmem [shape: f32[33,8], index: 1, kind: input, shape index: {}]   ;;  %s1237_s2 = inlined_call_operand.vmem [shape: f32[32,32], index: 2, kind: input, shape index: {}]   ;;  %s1238_s3 = inlined_call_operand.vmem [shape: f32[16,32], index: 3, kind: input, shape index: {}]   ;;  %s1239_s4 = inlined_call_operand.vmem [shape: f32[32,2], index: 4, kind: input, shape index: {}]   ;;  %s1240_s5 = inlined_call_operand.hbm [shape: f32[16,512], index: 5, kind: output, shape index: {}]  }
   0x1   :  { %12 = vsyncpa [#allocation3 + $0x1], 0  ;;  %s1055_s18 = smov 0   ;;  %s1057_s19 = smov 0  }
   0x2   :  { %s1059_s20 = smov 0   ;;  %s1061_s21 = smov 0  }
   0x3 LB: > { %s1076_s22 = sadd.s32 4294967295, %s1016_s21   ;;  %s777_s23 = sadd.s32 4294967294, %s1016_s21   ;;  %s1016_s21 = sphi %s1061_s21, %s1246_s21   ;;  %s1012_s20 = sphi %s1059_s20, %s1245_s20   ;;  %s1008_s19 = sphi %s1057_s19, %s1244_s19   ;;  %s1004_s18 = sphi %s1055_s18, %s1243_s18  }
   0x4   : > { %s1080_s24 = sadd.s32 1, %s1016_s21   ;;  %s135_s25 = sadd.s32 1, %s1012_s20 }
   0x5   : > { %s132_s26 = ssub.s32 %s1016_s21, %s1080_s24  ;;  %p145_p0 = scmp.ne.s32.totalorder %s1012_s20, %s1008_s19 }
   0x6   : > { %p133_p1 = scmp.eq.s32.totalorder %s132_s26, 0  ;;  %p146_p2 = scmp.eq.s32.totalorder %s1076_s22, 1 }
   0x7   : > { %p151_p3 = scmp.ne.s32.totalorder %s1008_s19, %s1004_s18  ;;  %p152_p4 = scmp.eq.s32.totalorder %s777_s23, 1 }
   0x8   : > { %s1091_s27 = scalar_select %p133_p1, %s1012_s20, %s135_s25  }
   0x9   : > { %p1093_p5 = por %p146_p2, %p145_p0  ;;  %p1097_p6 = por %p152_p4, %p151_p3 }
   0xa   : > { %p780_p7 = scmp.ge.s32.totalorder %s1016_s21, 1  ;;  %p191_p8 = scmp.lt.s32.totalorder %s1016_s21, 3 }
   0xc   : > { %p192_p9 = pnand %p780_p7, %p191_p8 }
   0xd   : > { %s782_s30 = sshll.u32 (!%p192_p9), %s1076_s22, 1  ;;  %v1018_v0 = vmov (!%p192_p9), 0.0   ;;  %v228_v3 = vld [vmem:[%s1236_s1] sm:$0xff] (!%p192_p9)  ;;  %vm233_vm0 = vcmask (!%p192_p9), 64512   ;;  %v229_v4 = vld [vmem:[%s1236_s1 + $0x8] sm:$0xff] (!%p192_p9)  ;;  %v230_v5 = vld [vmem:[%s1236_s1 + $0x10] sm:$0xff] (!%p192_p9)  ;;  %v346_v22 = vlaneseq (!%p192_p9) }
   0xe   : > { %195 = sbr.rel (%p192_p9) target bundleno = 803 (0x323), region = 40  ;;  %p220_p10 = scmp.lt.s32.totalorder (!%p192_p9), %s782_s30, 3  ;;  %313 = vmatprep.mubr.f32.mxu0 (!%p192_p9), %v1018_v0  ;;  %523 = vmatprep.mubr.f32.mxu1 (!%p192_p9), %v1018_v0  ;;  %v231_v6 = vld [vmem:[%s1236_s1 + $0x18] sm:$0xff] (!%p192_p9)  ;;  %v232_v7 = vld [vmem:[%s1236_s1 + $0x20] sm:$0x1] (!%p192_p9)  ;;  %v364_v9 = vld [vmem:[%s1239_s4 + $0x10] sm:$0xff] (!%p192_p9) }
   0xf   : > { %v1132_v8 = vld [vmem:[%s1239_s4] sm:$0xff] (!%p192_p9)  ;;  %v1019_v10 = vmov (!%p192_p9), 0   ;;  %v1141_v11 = vld [vmem:[%s1239_s4 + $0x8] sm:$0xff] (!%p192_p9)  ;;  %v365_v12 = vld [vmem:[%s1239_s4 + $0x18] sm:$0xff] (!%p192_p9)  ;;  %v347_v24 = vshrl.u32 (!%p192_p9), %v346_v22, 7  ;;  %vm446_vm1 = vcmask (!%p192_p9), 261120  }
  0x10   : > { %882 = vset.pattern.permute.xlu0 (!%p192_p9), %v1019_v10  ;;  %883 = vset.pattern.permute.xlu1 (!%p192_p9), %v1019_v10  ;;  %v423_v22 = vld [vmem:[%s1237_s2 + $0x8] sm:$0xff] (!%p192_p9)  ;;  %s216_s8 = sand.u32 (!%p192_p9), 1, %s1008_s19   ;;  %s816_s12 = sshll.u32 (!%p192_p9), %s1076_s22, 8 }
  0x11   : > { %428 = vperm.xlu0 (!%p192_p9), %882, %v1132_v8   ;;  %438 = vperm.xlu1 (!%p192_p9), %883, %v364_v9   ;;  %v348_v25 = vsub.s32 (!%p192_p9), 0, %v347_v24  ;;  %v425_v24 = vld [vmem:[%s1237_s2 + $0x18] sm:$0xff] (!%p192_p9)  ;;  %s1192_s15 = scalar_lea.hbm (!%p192_p9), %s1240_s5, %s816_s12  ;;  %s1194_s22 = scalar_lea.sflag (!%p192_p9), [#allocation3], %s216_s8 }
  0x12   : > { %s1021_s17 = smov (!%p192_p9), [#allocation2]  }
  0x13   : > { %s958_s23 = sshll.u32 (!%p192_p9), %s1021_s17, 4  ;;  %s959_s23 = int_to_ptr.vmem [resolvable:$false] %s958_s23 }
  0x14   : > { %s960_s25 = scalar_lea.vmem (!%p192_p9), %s959_s23, 1024 }
  0x15   : > { %s1248_s30 = smov (!%p220_p10, %s782_s30), 3  ;;  %433 = vperm.xlu0 %882, %v1141_v11   ;;  %443 = vperm.xlu1 %883, %v365_v12  }
  0x16   : > { %s783_s6 = sshll.u32 %s1248_s30, 3 }
  0x17   : > { %s223_s9 = scalar_lea.vmem %s1235_s0, %s783_s6 }
  0x18   : > { %v227_v1 = vld [vmem:[%s223_s9 + $0x8] sm:$0xff]  ;;  %v226_v2 = vld [vmem:[%s223_s9] sm:$0xff]  ;;  %s781_s9 = sshll.u32 %s216_s8, 5 }
  0x19   : > { %249 = vmatprep.subr.mxu0 %v227_v1  ;;  %s218_s10 = scalar_lea.vmem [#allocation2], %s781_s9 }
  0x1a   : > { %250 = vmatpush1.msra.mxu0 %v226_v2  ;;  %s715_s11 = sshll.u32 %s218_s10, 4  ;;  %s1187_s11 = int_to_ptr.vmem [resolvable:$true] %s715_s11 }
  0x1b   : > { %784 = vmatmul.mubr.msk.f32.vlgmr.msra.gmra.mrb[0].mxu0 %vm233_vm0, %v228_v3  ;;  %s954_s16 = scalar_lea.vmem %s1187_s11, 512  ;;  %p961_p0 = scmp.lt.s32.totalorder %s1187_s11, %s959_s23 }
  0x1c   : > { %319 = vmatprep.mubr.f32.mxu0 %v1018_v0  ;;  %p955_p11 = scmp.ne.s32.totalorder %s1187_s11, %s954_s16  ;;  %p962_p1 = scmp.lt.s32.totalorder %s960_s25, %s954_s16 }
  0x1e   : > { %p956_p12 = pnand %p955_p11, %p1093_p5  ;;  %p963_p2 = por %p962_p1, %p961_p0 }
  0x1f   : > { %785 = vmatmul.mubr.msk.f32.gmra.mrb[2].mxu0 %vm233_vm0, %v229_v4 }
  0x20   : > { %325 = vmatprep.mubr.f32.mxu0 %v1018_v0  ;;  %p957_p13 = pneg %p956_p12 }
  0x22   : > { %p964_p3 = pnand %p963_p2, %p957_p13 }
  0x23   : > { %786 = vmatmul.mubr.msk.f32.gmra.mrb[4].mxu0 %vm233_vm0, %v230_v5 }
  0x24   : > { %331 = vmatprep.mubr.f32.mxu0 %v1018_v0 }
  0x27   : > { %787 = vmatmul.mubr.msk.f32.gmra.mrb[6].mxu0 %vm233_vm0, %v231_v6 }
  0x28   : > { %337 = vmatprep.mubr.f32.mxu0 %v1018_v0 }
  0x2b   : > { %788 = vmatmul.mubr.msk.f32.gmra.mrb[8].mxu0 %vm233_vm0, %v232_v7 }
  0x2c   : > { %684 = vmatprep.mubr.f32.mxu0 %v1018_v0 }
  0xee   : > { %v315_v13 = vpop.f32.mrb[0].mxu0 }
  0xef   : > { %v317_v14 = vpop.f32.mrb[1].mxu0 }
  0xf2   : > { %v321_v15 = vpop.f32.mrb[2].mxu0 }
  0xf3   : > { %v323_v16 = vpop.f32.mrb[3].mxu0 }
  0xf6   : > { %v327_v17 = vpop.f32.mrb[4].mxu0 }
  0xf7   : > { %v329_v18 = vpop.f32.mrb[5].mxu0 }
  0xfa   : > { %v333_v19 = vpop.f32.mrb[6].mxu0 }
  0xfb   : > { %v335_v20 = vpop.f32.mrb[7].mxu0 }
  0xfe   : > { %v339_v21 = vpop.f32.mrb[8].mxu0 }
  0xff   : > { %886 = vrcp.f32 %v339_v21  ;;  %v341_v23 = vpop.f32.mrb[9].mxu0  ;;  %v422_v21 = vld [vmem:[%s1237_s2] sm:$0xff] }
 0x100   : > { %888 = vrcp.f32 %v341_v23  ;;  %v424_v23 = vld [vmem:[%s1237_s2 + $0x10] sm:$0xff] }
 0x109   : > { %v887_v26 = vpop.eup %886 }
 0x10a   : > { %v889_v27 = vpop.eup %888  ;;  %v349_v28 = vrot.slane %v887_v26, %v348_v25  ;;  %v429_v26 = vpop.permute.xlu0 %428 }
 0x10b   : > { %v353_v29 = vrot.slane %v889_v27, %v348_v25  ;;  %v1020_v25 = vmov 1  }
 0x10c   : > { %v354_v30 = vmul.f32 %v349_v28, %v315_v13  ;;  %v356_v31 = vmul.f32 %v349_v28, %v321_v15  ;;  %v1147_v32 = vmul.f32 %v349_v28, %v327_v17  ;;  %v1149_v33 = vmul.f32 %v349_v28, %v333_v19  ;;  %885 = vset.pattern.permute.xlu1 %v1020_v25 }
 0x10d   : > { %v355_v34 = vmul.f32 %v353_v29, %v317_v14  ;;  %v357_v35 = vmul.f32 %v353_v29, %v323_v16  ;;  %v359_v36 = vmul.f32 %v353_v29, %v329_v18  ;;  %v361_v37 = vmul.f32 %v353_v29, %v335_v20  ;;  %884 = vset.pattern.permute.xlu0 %v1020_v25 }
 0x10e   : > { %v789_v38 = vmul.f32 -1.442695, %v354_v30  ;;  %v791_v41 = vmul.f32 -1.442695, %v356_v31  ;;  %v793_v44 = vmul.f32 -1.442695, %v1147_v32  ;;  %611 = vperm.xlu1 %885, %v1141_v11   ;;  %607 = vperm.xlu0 %884, %v1132_v8  }
 0x10f   : > { %v790_v39 = vmul.f32 -1.442695, %v355_v34  ;;  %v792_v40 = vmul.f32 -1.442695, %v357_v35  ;;  %v794_v42 = vmul.f32 -1.442695, %v359_v36 }
 0x110   : > { %890 = vpow2.f32 %v789_v38  ;;  %v796_v43 = vmul.f32 -1.442695, %v361_v37  ;;  %v795_v45 = vmul.f32 -1.442695, %v1149_v33 }
 0x111   : > { %892 = vpow2.f32 %v790_v39 }
 0x112   : > { %894 = vpow2.f32 %v792_v40 }
 0x113   : > { %896 = vpow2.f32 %v791_v41 }
 0x114   : > { %898 = vpow2.f32 %v794_v42 }
 0x115   : > { %900 = vpow2.f32 %v796_v43 }
 0x116   : > { %902 = vpow2.f32 %v793_v44 }
 0x117   : > { %904 = vpow2.f32 %v795_v45 }
 0x11a   : > { %v891_v46 = vpop.eup %890 }
 0x11b   : > { %v893_v47 = vpop.eup %892  ;;  %v390_v48 = vadd.f32 1.0, %v891_v46 }
 0x11c   : > { %v895_v49 = vpop.eup %894  ;;  %v391_v50 = vadd.f32 1.0, %v893_v47 }
 0x11d   : > { %v897_v51 = vpop.eup %896  ;;  %v393_v52 = vadd.f32 1.0, %v895_v49  ;;  %906 = vrcp.f32 %v390_v48 }
 0x11e   : > { %v899_v53 = vpop.eup %898  ;;  %908 = vrcp.f32 %v391_v50  ;;  %v392_v54 = vadd.f32 1.0, %v897_v51 }
 0x11f   : > { %v901_v55 = vpop.eup %900  ;;  %910 = vrcp.f32 %v393_v52  ;;  %v395_v56 = vadd.f32 1.0, %v899_v53 }
 0x120   : > { %v903_v57 = vpop.eup %902  ;;  %912 = vrcp.f32 %v392_v54  ;;  %v397_v58 = vadd.f32 1.0, %v901_v55 }
 0x121   : > { %v905_v59 = vpop.eup %904  ;;  %914 = vrcp.f32 %v395_v56  ;;  %v394_v60 = vadd.f32 1.0, %v903_v57 }
 0x122   : > { %916 = vrcp.f32 %v397_v58  ;;  %v396_v61 = vadd.f32 1.0, %v905_v59 }
 0x123   : > { %918 = vrcp.f32 %v394_v60 }
 0x124   : > { %920 = vrcp.f32 %v396_v61 }
 0x127   : > { %v907_v62 = vpop.eup %906 }
 0x128   : > { %v909_v63 = vpop.eup %908  ;;  %v414_v3 = vmul.f32 %v907_v62, %v354_v30  ;;  %v434_v30 = vpop.permute.xlu0 %433 }
 0x129   : > { %v911_v1 = vpop.eup %910  ;;  %v415_v2 = vmul.f32 %v909_v63, %v355_v34 }
 0x12a   : > { %v913_v4 = vpop.eup %912  ;;  %v417_v5 = vmul.f32 %v911_v1, %v357_v35 }
 0x12b   : > { %v915_v6 = vpop.eup %914  ;;  %v416_v7 = vmul.f32 %v913_v4, %v356_v31 }
 0x12c   : > { %v917_v9 = vpop.eup %916  ;;  %v817_v10 = vpack.c.bf16 %v417_v5, %v415_v2  ;;  %v419_v12 = vmul.f32 %v915_v6, %v359_v36 }
 0x12d   : > { %v919_v13 = vpop.eup %918  ;;  %v819_v14 = vpack.c.bf16 %v416_v7, %v414_v3  ;;  %v421_v15 = vmul.f32 %v917_v9, %v361_v37  ;;  %v439_v37 = vpop.permute.xlu1 %438 }
 0x12e   : > { %v921_v16 = vpop.eup %920  ;;  %818 = vmatprep.subr.bf16.mxu1 %v817_v10  ;;  %v418_v17 = vmul.f32 %v919_v13, %v1147_v32 }
 0x12f   : > { %820 = vmatpush1.bf16.msra.mxu1 %v819_v14  ;;  %v821_v18 = vpack.c.bf16 %v421_v15, %v419_v12  ;;  %v420_v19 = vmul.f32 %v921_v16, %v1149_v33 }
 0x131   : > { %822 = vmatprep.subr.bf16.mxu1 %v821_v18  ;;  %v823_v20 = vpack.c.bf16 %v420_v19, %v418_v17  ;;  %v444_v44 = vpop.permute.xlu1 %443 }
 0x133   : > { %824 = vmatpush1.bf16.msra.mxu1 %v823_v20 }
 0x136   : > { %797 = vmatmul.mubr.msk.f32.vlgmr.msra.gmra.mrb[0].mxu1 %vm446_vm1, %v422_v21 }
 0x137   : > { %529 = vmatprep.mubr.f32.mxu1 %v1018_v0 }
 0x13a   : > { %798 = vmatmul.mubr.msk.f32.gmra.mrb[2].mxu1 %vm446_vm1, %v423_v22 }
 0x13b   : > { %535 = vmatprep.mubr.f32.mxu1 %v1018_v0 }
 0x13e   : > { %799 = vmatmul.mubr.msk.f32.gmra.mrb[4].mxu1 %vm446_vm1, %v424_v23 }
 0x13f   : > { %541 = vmatprep.mubr.f32.mxu1 %v1018_v0 }
 0x142   : > { %800 = vmatmul.mubr.msk.f32.gmra.mrb[6].mxu1 %vm446_vm1, %v425_v24 }
 0x143   : > { %690 = vmatprep.mubr.f32.mxu1 %v1018_v0 }
 0x209   : > { %v525_v27 = vpop.f32.mrb[0].mxu1 }
 0x20a   : > { %v526_v28 = vadd.f32 %v525_v27, %v429_v26  ;;  %v527_v29 = vpop.f32.mrb[1].mxu1  ;;  %v605_v27 = vld [vmem:[%s1238_s3 + $0x8] sm:$0xff] }
 0x20b   : > { %v528_v31 = vadd.f32 %v527_v29, %v429_v26  ;;  %v604_v26 = vld [vmem:[%s1238_s3] sm:$0xff]  ;;  %v608_v29 = vpop.permute.xlu0 %607 }
 0x20c   : > { %v801_v32 = vmul.f32 -1.442695, %v526_v28 }
 0x20d   : > { %v802_v33 = vmul.f32 -1.442695, %v528_v31  ;;  %v531_v34 = vpop.f32.mrb[2].mxu1 }
 0x20e   : > { %922 = vpow2.f32 %v801_v32  ;;  %v532_v35 = vadd.f32 %v531_v34, %v434_v30  ;;  %v533_v36 = vpop.f32.mrb[3].mxu1 }
 0x20f   : > { %924 = vpow2.f32 %v802_v33  ;;  %v534_v0 = vadd.f32 %v533_v36, %v434_v30 }
 0x210   : > { %v803_v38 = vmul.f32 -1.442695, %v532_v35 }
 0x211   : > { %v804_v39 = vmul.f32 -1.442695, %v534_v0  ;;  %v537_v11 = vpop.f32.mrb[4].mxu1 }
 0x212   : > { %926 = vpow2.f32 %v803_v38  ;;  %v538_v8 = vadd.f32 %v537_v11, %v439_v37  ;;  %v539_v40 = vpop.f32.mrb[5].mxu1 }
 0x213   : > { %928 = vpow2.f32 %v804_v39  ;;  %v540_v41 = vadd.f32 %v539_v40, %v439_v37 }
 0x214   : > { %v805_v42 = vmul.f32 -1.442695, %v538_v8 }
 0x215   : > { %v806_v43 = vmul.f32 -1.442695, %v540_v41  ;;  %v543_v45 = vpop.f32.mrb[6].mxu1 }
 0x216   : > { %930 = vpow2.f32 %v805_v42  ;;  %v544_v46 = vadd.f32 %v543_v45, %v444_v44  ;;  %v545_v47 = vpop.f32.mrb[7].mxu1 }
 0x217   : > { %932 = vpow2.f32 %v806_v43  ;;  %v546_v48 = vadd.f32 %v545_v47, %v444_v44 }
 0x218   : > { %v923_v49 = vpop.eup %922  ;;  %v807_v50 = vmul.f32 -1.442695, %v544_v46 }
 0x219   : > { %v925_v51 = vpop.eup %924  ;;  %v572_v52 = vadd.f32 1.0, %v923_v49  ;;  %v808_v53 = vmul.f32 -1.442695, %v546_v48 }
 0x21a   : > { %v573_v54 = vadd.f32 1.0, %v925_v51  ;;  %934 = vpow2.f32 %v807_v50 }
 0x21b   : > { %936 = vrcp.f32 %v572_v52 }
 0x21c   : > { %v927_v55 = vpop.eup %926  ;;  %938 = vpow2.f32 %v808_v53 }
 0x21d   : > { %v929_v56 = vpop.eup %928  ;;  %v574_v57 = vadd.f32 1.0, %v927_v55  ;;  %940 = vrcp.f32 %v573_v54 }
 0x21e   : > { %v575_v58 = vadd.f32 1.0, %v929_v56 }
 0x21f   : > { %942 = vrcp.f32 %v574_v57 }
 0x220   : > { %v931_v59 = vpop.eup %930  ;;  %944 = vrcp.f32 %v575_v58 }
 0x221   : > { %v933_v60 = vpop.eup %932  ;;  %v576_v61 = vadd.f32 1.0, %v931_v59 }
 0x222   : > { %v577_v63 = vadd.f32 1.0, %v933_v60 }
 0x223   : > { %946 = vrcp.f32 %v576_v61 }
 0x224   : > { %v935_v62 = vpop.eup %934 }
 0x225   : > { %v578_v1 = vadd.f32 1.0, %v935_v62  ;;  %v937_v2 = vpop.eup %936 }
 0x226   : > { %v939_v3 = vpop.eup %938  ;;  %v596_v9 = vmul.f32 %v937_v2, %v526_v28  ;;  %v612_v28 = vpop.permute.xlu1 %611 }
 0x227   : > { %948 = vrcp.f32 %v578_v1  ;;  %v941_v4 = vpop.eup %940  ;;  %v579_v5 = vadd.f32 1.0, %v939_v3 }
 0x228   : > { %950 = vrcp.f32 %v577_v63  ;;  %v597_v12 = vmul.f32 %v941_v4, %v528_v31 }
 0x229   : > { %v943_v6 = vpop.eup %942  ;;  %952 = vrcp.f32 %v579_v5 }
 0x22a   : > { %v945_v7 = vpop.eup %944  ;;  %v598_v10 = vmul.f32 %v943_v6, %v532_v35 }
 0x22b   : > { %v599_v13 = vmul.f32 %v945_v7, %v534_v0 }
 0x22c   : > { %v827_v14 = vpack.c.bf16 %v598_v10, %v596_v9 }
 0x22d   : > { %v825_v15 = vpack.c.bf16 %v599_v13, %v597_v12  ;;  %v947_v16 = vpop.eup %946 }
 0x22e   : > { %v600_v19 = vmul.f32 %v947_v16, %v538_v8 }
 0x22f   : > { %826 = vmatprep.subr.bf16.mxu0 %v825_v15  ;;  %833 = vmatprep.subr.bf16.mxu1 %v825_v15 }
 0x230   : > { %828 = vmatpush1.bf16.msra.mxu0 %v827_v14  ;;  %835 = vmatpush1.bf16.msra.mxu1 %v827_v14 }
 0x231   : > { %v949_v17 = vpop.eup %948 }
 0x232   : > { %v951_v18 = vpop.eup %950  ;;  %v602_v20 = vmul.f32 %v949_v17, %v544_v46 }
 0x233   : > { %v953_v21 = vpop.eup %952  ;;  %v601_v23 = vmul.f32 %v951_v18, %v540_v41 }
 0x234   : > { %v831_v22 = vpack.c.bf16 %v602_v20, %v600_v19  ;;  %v603_v24 = vmul.f32 %v953_v21, %v546_v48 }
 0x236   : > { %v829_v25 = vpack.c.bf16 %v603_v24, %v601_v23 }
 0x238   : > { %830 = vmatprep.subr.bf16.mxu0 %v829_v25  ;;  %834 = vmatprep.subr.bf16.mxu1 %v829_v25 }
 0x239   : > { %832 = vmatpush1.bf16.msra.mxu0 %v831_v22  ;;  %836 = vmatpush1.bf16.msra.mxu1 %v831_v22 }
 0x23c   : > { %809 = vmatmul.mubr.msk.f32.vlgmr.msra.gmra.mrb[10].mxu0 %vm446_vm1, %v604_v26  ;;  %810 = vmatmul.mubr.msk.f32.vlgmr.msra.gmra.mrb[8].mxu1 %vm446_vm1, %v605_v27 }
 0x30f   : > { %v686_v30 = vpop.f32.mrb[10].mxu0  ;;  %v692_v31 = vpop.f32.mrb[8].mxu1 }
 0x310   : > { %v693_v32 = vadd.f32 %v692_v31, %v612_v28  ;;  %v687_v33 = vadd.f32 %v686_v30, %v608_v29  ;;  %v688_v34 = vpop.f32.mrb[11].mxu0  ;;  %v694_v35 = vpop.f32.mrb[9].mxu1 }
 0x311   : > { %v689_v36 = vadd.f32 %v688_v34, %v608_v29  ;;  %v695_v0 = vadd.f32 %v694_v35, %v612_v28 }
 0x312   : > { %699 = vst [vmem:[%s218_s10 + $0x10] sm:$0xff] %v693_v32  ;;  %697 = vst [vmem:[%s218_s10] sm:$0xff] %v687_v33 }
 0x313   : > { %698 = vst [vmem:[%s218_s10 + $0x8] sm:$0xff] %v689_v36  ;;  %700 = vst [vmem:[%s218_s10 + $0x18] sm:$0xff] %v695_v0 }
 0x314   : > { %967 = shalt.err (!%p964_p3)
}
 0x315   : > { %s968_s26 = scalar_lea.hbm %s1192_s15, 512  ;;  %s972_s7 = scalar_lea.hbm %s1240_s5, 1024 }
 0x316   : > { %p969_p4 = scmp.ne.s32.totalorder %s1192_s15, %s968_s26  ;;  %p973_p9 = scmp.lt.u32.totalorder %s1192_s15, %s1240_s5 }
 0x317   : > { %p974_p10 = scmp.lt.u32.totalorder %s972_s7, %s968_s26  ;;  %p976_p12 = scmp.lt.u32.totalorder %s968_s26, %s1192_s15 }
 0x318   : > { %p970_p7 = pnand %p969_p4, %p1093_p5 }
 0x319   : > { %p975_p11 = por %p974_p10, %p973_p9 }
 0x31a   : > { %p971_p8 = pneg %p970_p7 }
 0x31b   : > { %p977_p13 = por %p976_p12, %p975_p11 }
 0x31d   : > { %p978_p0 = pnand %p977_p13, %p971_p8 }
 0x31f   : > { %981 = shalt.err (!%p978_p0)
}
 0x320   : > { %s1022_s10 = smov 256   ;;  %s1023_s12 = smov 512  }
 0x321   : > { %s1024_s13 = smov 16  }
 0x322   : > { %837 = dma.vmem_to_hbm [thread:$0]  (%p1093_p5), %s1187_s11, 512, %s1192_s15, %s1194_s22, %s1022_s10, %s1023_s12, %s1024_s13  }
 0x323 PF: > { %p843_p1 = scmp.ge.s32.totalorder %s1016_s21, 2  ;;  %s730_s14 = sand.u32 1, %s1004_s18  }
 0x324   : > { %s731_s16 = scalar_lea.sflag [#allocation3], %s730_s14 }
 0x325   : > { %p840_p2 = pnand %p843_p1, %p1097_p6 }
 0x327   : > { %999 = dma.done.wait (!%p840_p2), %s731_s16, 512  }
 0x328   : > { %1001 = vsyncadd (!%p840_p2), %s731_s16, 4294966784  ;;  %p15_p3 = scmp.ge.s32.totalorder %s1080_s24, 4   ;;  %s1243_s18 = smov %s1008_s19 }
 0x329   : > { %s1244_s19 = smov %s1012_s20  ;;  %s1245_s20 = smov %s1091_s27 }
 0x32a   : > { %s1246_s21 = smov %s1080_s24  ;;  %17 = sbr.rel (!%p15_p3) target bundleno = 3 (0x3), region = 75 }
 0x331   :  { %736 = vsyncpa [#allocation3], 1 }
 0x332   :  { %738 = vsyncpa [#allocation3 + $0x1], 1 }

</bundles_post_ra>
